<compile_context>
chip_gen: v6e
topology: v6e:2x2x1
jax: 0.10.0
libtpu: 0.0.40
codegen_flags: <defaults>
</compile_context>

<pallas_src>
import jax
import jax.numpy as jnp
from jax.experimental import pallas as pl
from jax.experimental.pallas import tpu as pltpu


def _linear_kernel(x_ref, w_ref, b_ref, o_ref):
    # x_ref: [tm, D]  w_ref: [D, O]  b_ref: [1, O]  o_ref: [tm, O]
    acc = jnp.dot(x_ref[...], w_ref[...], preferred_element_type=jnp.float32)
    o_ref[...] = (acc + b_ref[...]).astype(o_ref.dtype)


def _cost(B, D, O, itemsize=4):
    return pl.CostEstimate(
        flops=2 * B * D * O,
        bytes_accessed=itemsize * (B * D + D * O + O + B * O),
        transcendentals=0,
    )


_VMEM_LIMIT = 32 * 1024 * 1024  # explicit: v5e default is 16 MiB; v7x has 64 MiB total


def _linear_small(x, w, b2, out_dtype):
    """Whole problem lives in VMEM: no grid, no pipeline prologue/epilogue."""
    B, D = x.shape
    O = w.shape[1]
    return pl.pallas_call(
        _linear_kernel,
        out_shape=jax.ShapeDtypeStruct((B, O), out_dtype),
        in_specs=[
            pl.BlockSpec(memory_space=pltpu.MemorySpace.VMEM),
            pl.BlockSpec(memory_space=pltpu.MemorySpace.VMEM),
            pl.BlockSpec(memory_space=pltpu.MemorySpace.VMEM),
        ],
        out_specs=pl.BlockSpec(memory_space=pltpu.MemorySpace.VMEM),
        compiler_params=pltpu.CompilerParams(vmem_limit_bytes=_VMEM_LIMIT),
        cost_estimate=_cost(B, D, O),
    )(x, w, b2)


def _linear_tiled(x, w, b2, tm, out_dtype):
    """Large-batch path: stream x in TM-row tiles, keep weight/bias VMEM-resident.

    Uses a cdiv grid; the ragged final block is handled by Pallas (out-of-range
    output rows are discarded on write-back), so no padding / slicing copies.
    """
    B, D = x.shape
    O = w.shape[1]
    return pl.pallas_call(
        _linear_kernel,
        out_shape=jax.ShapeDtypeStruct((B, O), out_dtype),
        grid=(pl.cdiv(B, tm),),
        in_specs=[
            pl.BlockSpec((tm, D), lambda i: (i, 0)),   # batch tile streams
            pl.BlockSpec((D, O), lambda i: (0, 0)),    # weight stays resident
            pl.BlockSpec((1, O), lambda i: (0, 0)),    # bias stays resident
        ],
        out_specs=pl.BlockSpec((tm, O), lambda i: (i, 0)),
        compiler_params=pltpu.CompilerParams(
            dimension_semantics=("parallel",),          # v7x: shard batch over 2 TCs
            vmem_limit_bytes=_VMEM_LIMIT,
        ),
        cost_estimate=_cost(B, D, O),
    )(x, w, b2)


_TM = 4096            # multiple of 8; ~2 MiB lane-padded x tile, 16x fewer grid steps
_SMALL_MAX_ROWS = 16384  # x + lane-padded y ~ 16 MiB in VMEM -> still no-grid path


def linear_pallas(x, w, b, *, use_bf16_matmul=False):
    """y = x @ w + b  (equivalent to torch nn.Linear forward)."""
    B, D = x.shape
    O = w.shape[1]
    out_dtype = x.dtype
    b2 = b.reshape(1, O).astype(jnp.float32)  # bias added onto the f32 accumulator

    if use_bf16_matmul:
        # Opt-in: halves HBM read of x (dominant bytes); accumulation stays f32.
        x = x.astype(jnp.bfloat16)
        w = w.astype(jnp.bfloat16)

    if B <= _SMALL_MAX_ROWS:
        return _linear_small(x, w, b2, out_dtype)
    # Tiled path only triggers with >= 5 grid steps (B > 16384, TM = 4096),
    # so both v7x TensorCores always get work.
    return _linear_tiled(x, w, b2, _TM, out_dtype)


if __name__ == "__main__":
    key = jax.random.PRNGKey(0)
    kx, kw, kb, kx2 = jax.random.split(key, 4)

    batch = 8
    x_dim = 32
    out_features = 10

    # Deterministic parameter init (mimics torch uniform(-1/sqrt(fan_in), 1/sqrt(fan_in)))
    bound = 1.0 / (x_dim ** 0.5)
    w = jax.random.uniform(kw, (x_dim, out_features), jnp.float32, -bound, bound)
    b = jax.random.uniform(kb, (out_features,), jnp.float32, -bound, bound)

    # --- small path (no grid, whole problem in VMEM) ---
    x = jax.random.normal(kx, (batch, x_dim), dtype=jnp.float32)
    y = linear_pallas(x, w, b)
    jax.block_until_ready(y)
    y_ref = x @ w + b
    assert y.shape == (batch, out_features)
    assert jnp.allclose(y, y_ref, atol=1e-5, rtol=1e-5)

    # --- tiled path exercised directly at a small shape, with a RAGGED final
    #     block (1000 = 3*256 + 232) to validate the cdiv grid / no-pad path ---
    big_batch = 1000
    xb = jax.random.normal(kx2, (big_batch, x_dim), dtype=jnp.float32)
    b2 = b.reshape(1, out_features).astype(jnp.float32)
    yb = _linear_tiled(xb, w, b2, 256, jnp.float32)
    jax.block_until_ready(yb)
    yb_ref = xb @ w + b
    assert yb.shape == (big_batch, out_features)
    assert jnp.allclose(yb, yb_ref, atol=1e-5, rtol=1e-5)

    print("KERNEL_OK")
</pallas_src>

<mosaic_0001>
module attributes {stable_mosaic.version = 11 : i64} {
  func.func @_linear_kernel(%arg0: memref<8x32xf32, #tpu.memory_space<vmem>>, %arg1: memref<32x10xf32, #tpu.memory_space<vmem>>, %arg2: memref<1x10xf32, #tpu.memory_space<vmem>>, %arg3: memref<8x10xf32, #tpu.memory_space<vmem>>) attributes {dimension_semantics = [], scalar_prefetch = 0 : i64, scratch_operands = 0 : i64, tpu.core_type = #tpu.core_type<tc>} {
    %c0 = arith.constant 0 : index
    %c0_0 = arith.constant 0 : index
    %0 = vector.load %arg0[%c0, %c0_0] : memref<8x32xf32, #tpu.memory_space<vmem>>, vector<8x32xf32>
    %c0_1 = arith.constant 0 : index
    %c0_2 = arith.constant 0 : index
    %1 = vector.load %arg1[%c0_1, %c0_2] : memref<32x10xf32, #tpu.memory_space<vmem>>, vector<32x10xf32>
    %cst = arith.constant dense<0.000000e+00> : vector<8x10xf32>
    %2 = tpu.matmul %0, %1, %cst {dimension_numbers = #tpu.dot_dimension_numbers<[1], [0], [0], [1], [0, 0, 1, 1], [], []>} : vector<8x32xf32>, vector<32x10xf32>, vector<8x10xf32> -> vector<8x10xf32>
    %c0_3 = arith.constant 0 : index
    %c0_4 = arith.constant 0 : index
    %3 = vector.load %arg2[%c0_3, %c0_4] : memref<1x10xf32, #tpu.memory_space<vmem>>, vector<1x10xf32>
    %4 = vector.broadcast %3 : vector<1x10xf32> to vector<8x10xf32>
    %5 = arith.addf %2, %4 : vector<8x10xf32>
    %c0_5 = arith.constant 0 : index
    %c0_6 = arith.constant 0 : index
    %6 = vector.load %arg3[%c0_5, %c0_6] : memref<8x10xf32, #tpu.memory_space<vmem>>, vector<8x10xf32>
    tpu.vector_store %arg3[%c0_5, %c0_6], %5 {strides = array<i32>} : memref<8x10xf32, #tpu.memory_space<vmem>>, vector<8x10xf32>,
    return
  }
}

</mosaic_0001>

<bundles_post_ra>
// kernel: tpu_custom_call.1
= control target key start
LH: loop header
LB: loop body
LE: loop exit
PB: predicated region body
PF: predicated region fallthrough
CT: control target
= control target key end

     0   :  { %v160_v1 = vmov 0.0   ;;  %vm161_vm0 = vmmov 0   ;;  %s204_s0 = inlined_call_operand.vmem [shape: f32[8,32], index: 0, kind: input, shape index: {}]   ;;  %s205_s1 = inlined_call_operand.vmem [shape: f32[32,10], index: 1, kind: input, shape index: {}]   ;;  %s206_s2 = inlined_call_operand.vmem [shape: f32[1,10], index: 2, kind: input, shape index: {}]   ;;  %s207_s3 = inlined_call_operand.hbm [shape: f32[8,10], index: 3, kind: output, shape index: {}]  }
   0x1   :  { %v19_v0 = vld [vmem:[%s205_s1 + $0x18] sm:$0xff]  ;;  %124 = vmatprep.subr.mxu0 %v160_v1  ;;  %v18_v2 = vld [vmem:[%s205_s1 + $0x10] sm:$0xff]  ;;  %132 = vmatprep.mubr.msk.f32.mxu0 %vm161_vm0, %v160_v1 }
   0x2   :  { %125 = vmatpush3.msra.mxu0 %v19_v0 }
   0x3   :  { %8 = vsyncpa [#allocation3], 0  ;;  %126 = vmatprep.subr.mxu0 %v160_v1  ;;  %v17_v3 = vld [vmem:[%s205_s1 + $0x8] sm:$0xff]  ;;  %v16_v4 = vld [vmem:[%s205_s1] sm:$0xff]  ;;  %vm27_vm1 = vcmask 261120   ;;  %s162_s24 = smov [#allocation2]  }
   0x4   :  { %127 = vmatpush3.msra.mxu0 %v18_v2  ;;  %v15_v5 = vld [vmem:[%s204_s0] sm:$0xff]  ;;  %s109_s25 = sshll.u32 %s162_s24, 4  ;;  %vm101_vm2 = vcmask 80896   ;;  %s110_s25 = int_to_ptr.vmem [resolvable:$true] %s109_s25 }
   0x5   :  { %128 = vmatprep.subr.mxu0 %v160_v1  ;;  %v117_v6 = vld [vmem:[%s206_s2] ss:$0 sm:$0xff]  ;;  %s138_s1 = scalar_lea.vmem %s110_s25, 128  ;;  %p143_p1 = scmp.lt.s32.totalorder %s110_s25, %s110_s25 }
   0x6   :  { %129 = vmatpush3.msra.mxu0 %v17_v3  ;;  %p139_p0 = scmp.ne.s32.totalorder %s110_s25, %s138_s1  ;;  %p144_p2 = scmp.lt.s32.totalorder %s138_s1, %s138_s1 }
   0x7   :  { %130 = vmatprep.subr.mxu0 %v160_v1 }
   0x8   :  { %131 = vmatpush3.msra.mxu0 %v16_v4  ;;  %p145_p3 = por %p144_p2, %p143_p1 }
   0x9   :  { %133 = vmatmul.mubr.msk.f32.vlgmr.msra.gmra.mxu0 %vm27_vm1, %v15_v5 }
   0xa   :  { %p146_p4 = pnand %p145_p3, %p139_p0 }
  0xc9   :  { %v97_v7 = vpop.f32.mrf.mxu0 }
  0xca   :  { %v98_v8 = vadd.f32 %v117_v6, %v97_v7 }
  0xcb   :  { %v134_v9 = vpop.f32.mrf.mxu0 }
  0xcc   :  { %102 = vst.msk [vmem:[#allocation2] sm:$0xff] %vm101_vm2, %v98_v8 }
  0xcd   :  { %149 = shalt.err (!%p146_p4)
}
  0xce   :  { %112 = dma.vmem_to_hbm [thread:$0]  %s110_s25, 128, %s207_s3, [#allocation3]  }
  0xcf   :  { %158 = dma.done.wait [#allocation3], 128  }
  0xd0   :  { %159 = vsyncadd [#allocation3], 4294967168 }
  0xd1   :  { %116 = vsyncpa [#allocation3], 1 }

</bundles_post_ra>
